<compile_context>
chip_gen: v7x
topology: tpu7x:2x2x1
jax: 0.10.0
libtpu: 0.0.40
codegen_flags: <defaults>
</compile_context>

<pallas_src>
import functools

import jax
import jax.numpy as jnp
from jax.experimental import pallas as pl
from jax.experimental.pallas import tpu as pltpu


# ----------------------- hardware-aware constants -----------------------

def _vmem_capacity_bytes():
    try:
        return int(pltpu.get_tpu_info().vmem_capacity_bytes)
    except Exception:
        return 64 << 20          # conservative fallback (v7x per-TensorCore)


_VMEM_CAP = _vmem_capacity_bytes()
# Scoped VMEM limit handed to Mosaic (headroom left for compiler temporaries).
_VMEM_LIMIT = int(min(_VMEM_CAP // 2, 96 << 20))
# Per-pallas_call working-set budget used by the block-size heuristics
# (the per-block estimates below include the 2x BlockSpec double-buffering).
_BLOCK_BUDGET = int(min(_VMEM_CAP // 6, 20 << 20))


# ----------------------------- helpers -----------------------------

def _round_up(x, mult):
    return ((x + mult - 1) // mult) * mult


def _pick_block(n, cap=1024):
    """Largest divisor of n that is <= cap and a multiple of 8 (or n itself),
    preferring multiples of the MXU row dim (256/128).  No forced >=2-step
    split (perf review): splitting only pays on multi-TensorCore parts."""
    cap = min(cap, n)
    for pref in (256, 128, 8):
        blk = cap - cap % pref
        while blk >= pref:
            if n % blk == 0:
                return blk
            blk -= pref
    return n


def _pick_lane_block(n, d, budget):
    """Largest multiple-of-128 divisor of n (n already padded to 128k) whose
    double-buffered per-block footprint fits the VMEM budget."""
    per_lane = (4 * d * d + 2 * d) * 4 + 4 * d * d * 4   # dbl-buf u,s,out + temps
    cap = max(128, (budget // max(per_lane, 1)) // 128 * 128)
    cap = min(cap, n)
    blk = max(128, cap - cap % 128)
    while blk > 128 and n % blk:
        blk -= 128
    return blk if n % blk == 0 else n


# ----------------------------- Pallas kernels -----------------------------

def _qkv_kernel(x_ref, w_ref, o_ref):
    """One head / lane-tile of the flattened SPD bilinear transform:
    vec_row(W^T X W) = vec_row(X) @ kron(W, W)  (single MXU matmul)."""
    # TODO(synk): bf16 cast of x/w here (3-4x MXU) deferred pending end-to-end
    # accuracy validation -- the result feeds eigh / the matrix log (flagged in
    # the perf-review correctness concerns).
    o_ref[...] = jnp.dot(x_ref[...], w_ref[...],
                         preferred_element_type=jnp.float32)


def _reconstruct_kernel(is_log, d, u_ref, s_ref, o_ref):
    """out[i, k, n] = sum_j u[i, j, n] * f(s[j, n]) * u[k, j, n]
    Batch on the lane axis -> pure VPU broadcasts + sublane reductions with
    full-width lane-dense stores (no tiny d x d MXU matmuls)."""
    u = u_ref[...]                                   # (d, d, blk)  u_t[i, j, n]
    s = s_ref[...]                                   # (d, blk)     s_t[j, n]
    if is_log:
        # relative clamp: f32 eigh roundoff can leave tiny/negative eigenvalues
        smax = jnp.max(s, axis=0, keepdims=True)     # (1, blk)
        fs = jnp.log(jnp.maximum(s, 1e-6 * smax))    # EUP transcendental
    else:
        fs = jnp.exp(s)
    a = u * fs[None, :, :]                           # a[i, j, n] = u[i,j,n] f(s[j,n])
    rows = []
    for i in range(d):                               # d is small & static: unrolled
        ai = a[i]                                    # (d, blk) leading-dim index
        rows.append(jnp.sum(ai[None, :, :] * u, axis=1))   # sum over j -> (d, blk)
    o_ref[...] = jnp.stack(rows, axis=0)             # (d, d, blk)


def _attention_kernel(lq_ref, lk_ref, lv_ref, o_ref):
    """Gram-form log-Euclidean energy -> softmax over the K index -> weighted
    log-mean.  Inputs are vec_row(log .) in the flattened (b, m, d*d) layout."""
    qf = lq_ref[...]                                 # (b, m, dd)
    kf = lk_ref[...]
    vf = lv_ref[...]
    qn = jnp.sum(qf * qf, axis=-1, keepdims=True)    # (b, m, 1)
    kn = jnp.sum(kf * kf, axis=-1, keepdims=True)
    gram = jnp.einsum('bjd,bid->bji', qf, kf,
                      preferred_element_type=jnp.float32)    # (b, m_q, m_k) MXU
    # E[b, j, i] = || vec(log Q_j) - vec(log K_i) ||^2
    energy = jnp.maximum(qn + jnp.swapaxes(kn, -1, -2) - 2.0 * gram, 0.0)
    # exact divide: feeds the softmax exponent; O(m^2) VALU, negligible
    f = 1.0 / (1.0 + jnp.log(1.0 + energy))
    # torch: nn.Softmax(dim=-2) over the K index i (== last axis in this layout)
    mx = jnp.max(f, axis=-1, keepdims=True)
    e = jnp.exp(f - mx)
    attn = e * pl.reciprocal(jnp.sum(e, axis=-1, keepdims=True), approx=True)
    # out[b, j, :] = sum_i attn[b, j, i] * vec(log V_i)   (MXU)
    o_ref[...] = jnp.einsum('bji,bid->bjd', attn, vf,
                            preferred_element_type=jnp.float32)


# ----------------------------- Pallas wrappers -----------------------------

def _maybe_increase_dim(x, d_in, d_out):
    """SPDIncreaseDim: embed X top-left, identity on the new diagonal entries."""
    if d_out <= d_in:
        return x
    pad = d_out - d_in
    x = jnp.pad(x, ((0, 0), (0, pad), (0, pad)))
    add = jnp.diag(jnp.concatenate([jnp.zeros(d_in), jnp.ones(pad)])).astype(x.dtype)
    return x + add[None]


def fused_qkv_transform(x, w_kron, d_in, d_out):
    """(Q|K|V) = W^T X W for the three heads via flat Kronecker MXU matmuls.
    Output (3, N, d_out^2): head split on the LEADING axis so the downstream
    eigh input is a free reshape.  X stays resident across the head / lane-tile
    grid axes (one read of X); the weight is lane-tiled for VMEM safety."""
    x = _maybe_increase_dim(x, d_in, d_out)            # (N, r, r)
    N, r, _ = x.shape
    dd = d_out * d_out
    kdim = r * r
    xf = x.reshape(N, kdim)
    blk = _pick_block(N)

    # Lane-tile the Kronecker weight so the resident block fits the VMEM budget
    # for large d_out (relevant on v7x with 64 MiB VMEM).
    if dd % 128 == 0:
        tn_cap = max(128, (_BLOCK_BUDGET // (8 * kdim)) // 128 * 128)
        tn = min(dd, tn_cap)
        while dd % tn:
            tn -= 128
    else:
        tn = dd                                        # full extent (e.g. dd=64)

    return pl.pallas_call(
        _qkv_kernel,
        out_shape=jax.ShapeDtypeStruct((3, N, dd), jnp.float32),
        grid=(N // blk, 3, dd // tn),                  # head/lane axes innermost
        in_specs=[pl.BlockSpec((blk, kdim), lambda i, h, j: (i, 0)),
                  pl.BlockSpec((None, kdim, tn), lambda i, h, j: (h, 0, j))],
        out_specs=pl.BlockSpec((None, blk, tn), lambda i, h, j: (h, i, j)),
        compiler_params=pltpu.CompilerParams(
            dimension_semantics=("parallel", "parallel", "parallel"),
            vmem_limit_bytes=_VMEM_LIMIT),
    )(xf, w_kron)


def spd_reconstruct(u, s, is_log):
    """U diag(f(s)) U^T over a batch of symmetric matrices, batch-on-lane layout.
    The wrapper transposes to (d, d, N) / (d, N) and zero-pads the batch axis to
    a multiple of 128 so every kernel store is an unmasked full-width vst."""
    N, d, _ = u.shape
    u_t = jnp.transpose(u, (1, 2, 0))                  # (d, d, N)
    s_t = jnp.transpose(s, (1, 0))                     # (d, N)
    Np = _round_up(N, 128)
    if Np > N:
        u_t = jnp.pad(u_t, ((0, 0), (0, 0), (0, Np - N)))
        s_t = jnp.pad(s_t, ((0, 0), (0, Np - N)), constant_values=1.0)
    blk = _pick_lane_block(Np, d, _BLOCK_BUDGET)
    out_t = pl.pallas_call(
        functools.partial(_reconstruct_kernel, is_log, d),
        out_shape=jax.ShapeDtypeStruct((d, d, Np), jnp.float32),
        grid=(Np // blk,),
        in_specs=[pl.BlockSpec((d, d, blk), lambda i: (0, 0, i)),
                  pl.BlockSpec((d, blk), lambda i: (0, i))],
        out_specs=pl.BlockSpec((d, d, blk), lambda i: (0, 0, i)),
        compiler_params=pltpu.CompilerParams(
            dimension_semantics=("parallel",),
            vmem_limit_bytes=_VMEM_LIMIT),
    )(u_t, s_t)
    return jnp.transpose(out_t[:, :, :N], (2, 0, 1))   # (N, d, d)


def attention_mean_logs(logs_flat, bs, m, d):
    """logs_flat: (3, bs, m, d*d) stacked vec_row(logQ|logK|logV).
    Returns the attention-weighted log-mean, flattened (bs, m, d*d)."""
    dd = d * d
    # 2x for BlockSpec double buffering of the 3 inputs + output, plus the
    # (bblk, m, m) energy/softmax intermediates (perf-review VMEM fix).
    per_elem = (8 * m * dd + 6 * m * m) * 4
    bblk = max(1, min(bs, _BLOCK_BUDGET // max(per_elem, 1)))
    while bs % bblk:
        bblk -= 1

    def head_spec(h):
        return pl.BlockSpec((None, bblk, m, dd), lambda b, h=h: (h, b, 0, 0))

    # TODO(synk): for production sequence lengths m >= ~256, tile the (m, m)
    # energy flash-style over (tq, tk) query/key blocks instead of
    # materializing it per batch element.
    return pl.pallas_call(
        _attention_kernel,
        out_shape=jax.ShapeDtypeStruct((bs, m, dd), jnp.float32),
        grid=(bs // bblk,),
        in_specs=[head_spec(0), head_spec(1), head_spec(2)],
        out_specs=pl.BlockSpec((bblk, m, dd), lambda b: (b, 0, 0)),
        compiler_params=pltpu.CompilerParams(
            dimension_semantics=("parallel",),
            vmem_limit_bytes=_VMEM_LIMIT),
    )(logs_flat, logs_flat, logs_flat)


# ----------------------------- Plain JAX glue -----------------------------

def _orthogonal(key, rows, cols):
    """Deterministic equivalent of nn.init.orthogonal_ for a (rows, cols) weight."""
    a = jax.random.normal(key, (rows, cols), dtype=jnp.float32)
    q, r = jnp.linalg.qr(a)
    dsgn = jnp.sign(jnp.diagonal(r))
    dsgn = jnp.where(dsgn == 0, 1.0, dsgn)
    return (q * dsgn[None, :]).astype(jnp.float32)


def make_params(key, d_in, d_out):
    kq, kk, kv = jax.random.split(key, 3)
    rows = max(d_in, d_out)
    w_q = _orthogonal(kq, rows, d_out)
    w_k = _orthogonal(kk, rows, d_out)
    w_v = _orthogonal(kv, rows, d_out)
    # vec_row(W^T X W) = vec_row(X) @ kron(W, W).  Precomputed once here (pure
    # constant folding for inference -- perf-review item) with the heads
    # stacked on a leading axis for the squeezed BlockSpec in the QKV kernel.
    w_kron = jnp.stack([jnp.kron(w, w) for w in (w_q, w_k, w_v)], axis=0)
    return {'w_q': w_q, 'w_k': w_k, 'w_v': w_v, 'w_kron': w_kron}


def attention_manifold_forward(params, x, d_in, d_out, shape=None):
    """Mirrors AttentionManifold.forward; returns (output, shape_list)."""
    if x.ndim == 3 and shape is not None:
        x = x.reshape(shape[0], shape[1], d_in, d_in)
    x = x.astype(jnp.float32)
    bs, m = x.shape[0], x.shape[1]
    N = bs * m
    d = d_out
    dd = d * d
    xf = x.reshape(N, d_in, d_in)

    # One fused pallas_call for all three SPD transforms: (3, N, dd).
    yf = fused_qkv_transform(xf, params['w_kron'], d_in, d_out)

    # TODO(synk): symmetric eigendecomposition has no Pallas lowering; batched
    # jnp.linalg.eigh over the stacked Q|K|V (one solver call).
    s_all, u_all = jnp.linalg.eigh(yf.reshape(3 * N, d, d))
    logs = spd_reconstruct(u_all, s_all, True)           # (3N, d, d) = log Q|K|V
    logs_flat = logs.reshape(3, bs, m, dd)

    mean_log = attention_mean_logs(logs_flat, bs, m, d)  # (bs, m, dd)

    so, uo = jnp.linalg.eigh(mean_log.reshape(N, d, d))
    out = spd_reconstruct(uo, so, False)                 # (N, d, d)
    return out, [bs, m, -1]


# ----------------------------- pure-JAX reference -----------------------------

def _tensor_log_ref(t):
    s, u = jnp.linalg.eigh(t)
    return jnp.einsum('...ij,...j,...kj->...ik', u, jnp.log(s), u)


def _tensor_exp_ref(t):
    s, u = jnp.linalg.eigh(t)
    return jnp.einsum('...ij,...j,...kj->...ik', u, jnp.exp(s), u)


def reference_forward(params, x, d_in, d_out):
    bs, m = x.shape[0], x.shape[1]
    xf = x.reshape(bs * m, d_in, d_in).astype(jnp.float32)

    def trans(w):
        y = _maybe_increase_dim(xf, d_in, d_out)
        return jnp.einsum('pi,npq,qo->nio', w, y, w).reshape(bs, m, d_out, d_out)

    Q, K, V = trans(params['w_q']), trans(params['w_k']), trans(params['w_v'])
    logQ, logK, logV = _tensor_log_ref(Q), _tensor_log_ref(K), _tensor_log_ref(V)
    diff = logQ[:, None, :, :, :] - logK[:, :, None, :, :]       # (bs, i, j, d, d)
    energy = jnp.sum(diff * diff, axis=(-1, -2))                 # (bs, i, j)
    f = 1.0 / (1.0 + jnp.log(1.0 + energy))
    prob = jax.nn.softmax(f, axis=-2)                            # over i
    atten = jnp.swapaxes(prob, -1, -2)                           # (bs, j, i)
    mean_log = jnp.einsum('bji,bipq->bjpq', atten, logV)
    out = _tensor_exp_ref(mean_log).reshape(bs * m, d_out, d_out)
    return out


# ----------------------------- main -----------------------------

if __name__ == "__main__":
    key = jax.random.PRNGKey(0)
    bs, m, d_in, d_out = 2, 8, 16, 8

    kx, kp = jax.random.split(key)
    a = jax.random.normal(kx, (bs, m, d_in, d_in), dtype=jnp.float32)
    # batch of SPD matrices, well conditioned so the matrix log is stable
    x = jnp.einsum('bmij,bmkj->bmik', a, a) / d_in + jnp.eye(d_in, dtype=jnp.float32)

    params = make_params(kp, d_in, d_out)

    out, out_shape = attention_manifold_forward(params, x, d_in, d_out)
    out = jax.block_until_ready(out)

    assert out.shape == (bs * m, d_out, d_out)
    assert out_shape == [bs, m, -1]

    ref = reference_forward(params, x, d_in, d_out)
    max_err = float(jnp.max(jnp.abs(out - ref)))
    assert jnp.allclose(out, ref, rtol=1e-2, atol=1e-2), f"max abs err {max_err}"

    print("KERNEL_OK")
</pallas_src>

<mosaic_0001>
module attributes {stable_mosaic.version = 11 : i64} {
  func.func @_qkv_kernel(%arg0: i32, %arg1: i32, %arg2: i32, %arg3: memref<16x256xf32, #tpu.memory_space<vmem>>, %arg4: memref<1x256x64xf32, #tpu.memory_space<vmem>>, %arg5: memref<1x16x64xf32, #tpu.memory_space<vmem>>) attributes {dimension_semantics = [#tpu.dimension_semantics<parallel>, #tpu.dimension_semantics<parallel>, #tpu.dimension_semantics<parallel>], iteration_bounds = array<i64: 1, 3, 1>, scalar_prefetch = 0 : i64, scratch_operands = 0 : i64, tpu.core_type = #tpu.core_type<tc>, window_params = [{transform_indices = @transform_0, window_bounds = array<i64: 16, 256>}, {transform_indices = @transform_1, window_bounds = array<i64: 1, 256, 64>}, {transform_indices = @transform_2, window_bounds = array<i64: 1, 16, 64>}]} {
    %c0 = arith.constant 0 : index
    %c0_0 = arith.constant 0 : index
    %0 = vector.load %arg3[%c0, %c0_0] : memref<16x256xf32, #tpu.memory_space<vmem>>, vector<16x256xf32>
    %c0_1 = arith.constant 0 : index
    %c0_2 = arith.constant 0 : index
    %c0_3 = arith.constant 0 : index
    %1 = vector.load %arg4[%c0_1, %c0_2, %c0_3] : memref<1x256x64xf32, #tpu.memory_space<vmem>>, vector<1x256x64xf32>
    %2 = vector.shape_cast %1 : vector<1x256x64xf32> to vector<256x64xf32>
    %cst = arith.constant dense<0.000000e+00> : vector<16x64xf32>
    %3 = tpu.matmul %0, %2, %cst {dimension_numbers = #tpu.dot_dimension_numbers<[1], [0], [0], [1], [0, 0, 1, 1], [], []>} : vector<16x256xf32>, vector<256x64xf32>, vector<16x64xf32> -> vector<16x64xf32>
    %c0_4 = arith.constant 0 : index
    %c0_5 = arith.constant 0 : index
    %c0_6 = arith.constant 0 : index
    %4 = vector.load %arg5[%c0_4, %c0_5, %c0_6] : memref<1x16x64xf32, #tpu.memory_space<vmem>>, vector<1x16x64xf32>
    %5 = vector.shape_cast %4 : vector<1x16x64xf32> to vector<16x64xf32>
    %6 = vector.shape_cast %3 : vector<16x64xf32> to vector<1x16x64xf32>
    tpu.vector_store %arg5[%c0_4, %c0_5, %c0_6], %6 {strides = array<i32>} : memref<1x16x64xf32, #tpu.memory_space<vmem>>, vector<1x16x64xf32>,
    return
  }
  func.func @transform_0(%arg0: i32, %arg1: i32, %arg2: i32) -> (i32, i32) {
    %c0_i32 = arith.constant 0 : i32
    %c0_i32_0 = arith.constant 0 : i32
    return %arg0, %c0_i32 : i32, i32
  }
  func.func @transform_1(%arg0: i32, %arg1: i32, %arg2: i32) -> (i32, i32, i32) {
    %c0_i32 = arith.constant 0 : i32
    %c0_i32_0 = arith.constant 0 : i32
    return %arg1, %c0_i32, %arg2 : i32, i32, i32
  }
  func.func @transform_2(%arg0: i32, %arg1: i32, %arg2: i32) -> (i32, i32, i32) {
    %c0_i32 = arith.constant 0 : i32
    return %arg1, %arg0, %arg2 : i32, i32, i32
  }
}

</mosaic_0001>

<bundles_post_ra>
// kernel: tpu_custom_call.1
= control target key start
LH: loop header
LB: loop body
LE: loop exit
PB: predicated region body
PF: predicated region fallthrough
CT: control target
= control target key end

     0   :  { %7 = vsyncpa [#allocation3], 0  ;;  %s849_s0 = inlined_call_operand.vmem [shape: f32[16,256], index: 0, kind: input, shape index: {}]   ;;  %s850_s1 = inlined_call_operand.vmem [shape: f32[3,256,64], index: 1, kind: input, shape index: {}]   ;;  %s851_s2 = inlined_call_operand.hbm [shape: f32[3,16,64], index: 2, kind: output, shape index: {}]  }
   0x1   :  { %9 = vsyncpa [#allocation3 + $0x1], 0  ;;  %s688_s9 = smov 0   ;;  %s690_s10 = smov 0  }
   0x2   :  { %s692_s11 = smov 0   ;;  %s694_s12 = smov 0  }
   0x3   :  { %s696_s13 = smov 0   ;;  %s698_s14 = smov 0  }
   0x4 LB: > { %s431_s15 = sadd.s32 4294967295, %s668_s14   ;;  %s432_s16 = sadd.s32 4294967294, %s668_s14   ;;  %s668_s14 = sphi %s698_s14, %s15_s14   ;;  %s664_s13 = sphi %s696_s13, %s858_s13   ;;  %s660_s12 = sphi %s694_s12, %s857_s12   ;;  %s656_s11 = sphi %s692_s11, %s856_s11   ;;  %s652_s10 = sphi %s690_s10, %s855_s10   ;;  %s648_s9 = sphi %s688_s9, %s854_s9  }
   0x5   : > { %s30_s17 = sadd.s32 1, %s664_s13  ;;  %s99_s18 = sadd.s32 1, %s656_s11 }
   0x6   : > { %p32_p0 = scmp.ge.s32.totalorder %s30_s17, 3  ;;  %p109_p1 = scmp.ne.s32.totalorder %s656_s11, %s652_s10 }
   0x7   : > { %p110_p2 = scmp.eq.s32.totalorder %s431_s15, 2  ;;  %p115_p3 = scmp.ne.s32.totalorder %s652_s10, %s648_s9 }
   0x8   : > { %s860_s17 = smov (%p32_p0, %s30_s17), 0  ;;  %p116_p5 = scmp.eq.s32.totalorder %s432_s16, 2 }
   0x9   : > { %p728_p4 = por %p110_p2, %p109_p1  ;;  %s92_s20 = ssub.s32 %s664_s13, %s860_s17 }
   0xa   : > { %p436_p6 = scmp.ge.s32.totalorder %s668_s14, 1  ;;  %p97_p7 = scmp.eq.s32.totalorder %s92_s20, 0 }
   0xb   : > { %p735_p8 = por %p116_p5, %p115_p3  ;;  %p155_p9 = scmp.lt.s32.totalorder %s668_s14, 4 }
   0xc   : > { %s741_s22 = scalar_select %p97_p7, %s656_s11, %s99_s18  }
   0xd   : > { %p156_p10 = pnand %p436_p6, %p155_p9 }
   0xe   : > { %p193_p11 = scmp.lt.s32.totalorder (!%p156_p10), %s660_s12, 2  ;;  %v203_v0 = vld [vmem:[%s849_s0 + $0x8] sm:$0xff] (!%p156_p10)  ;;  %v205_v1 = vld [vmem:[%s849_s0 + $0x18] sm:$0xff] (!%p156_p10)  ;;  %v202_v50 = vld [vmem:[%s849_s0] sm:$0xff] (!%p156_p10)  ;;  %s183_s8 = sand.u32 (!%p156_p10), 1, %s652_s10   ;;  %vm313_vm0 = vcmask (!%p156_p10), 523264  }
   0xf   : > { %159 = sbr.rel (%p156_p10) target bundleno = 291 (0x123), region = 28  ;;  %302 = vmatprep.mubr.f32.mxu0 (!%p156_p10), %v203_v0  ;;  %307 = vmatprep.mubr.f32.mxu1 (!%p156_p10), %v205_v1  ;;  %v204_v51 = vld [vmem:[%s849_s0 + $0x10] sm:$0xff] (!%p156_p10)  ;;  %s437_s15 = sshll.u32 (!%p156_p10), %s183_s8, 4 }
  0x10   : > { %s185_s16 = scalar_lea.vmem (!%p156_p10), [#allocation2], %s437_s15  ;;  %s446_s20 = sshll.u32 (!%p156_p10), %s660_s12, 8 }
  0x11   : > { %s333_s18 = sshll.u32 (!%p156_p10), %s185_s16, 4  ;;  %s801_s25 = scalar_lea.hbm (!%p156_p10), %s851_s2, %s446_s20  ;;  %s796_s18 = int_to_ptr.vmem [resolvable:$true] %s333_s18 }
  0x12   : > { %s590_s26 = scalar_lea.vmem (!%p156_p10), %s796_s18, 256 }
  0x13   : > { %p591_p12 = scmp.ne.s32.totalorder (!%p156_p10), %s796_s18, %s590_s26 }
  0x15   : > { %p592_p13 = pnand (!%p156_p10), %p591_p12, %p728_p4 }
  0x16   : > { %s194_s27 = scalar_select %p193_p11, %s660_s12, 2 }
  0x17   : > { %s803_s12 = scalar_lea.sflag [#allocation3], %s183_s8  ;;  %p593_p0 = pneg %p592_p13 }
  0x18   : > { %s445_s28 = sshll.u32 %s194_s27, 8  ;;  %s670_s27 = smov [#allocation2]  }
  0x19   : > { %s754_s3 = scalar_lea.vmem %s850_s1, %s445_s28  ;;  %s594_s28 = sshll.u32 %s670_s27, 4  ;;  %s595_s28 = int_to_ptr.vmem [resolvable:$false] %s594_s28 }
  0x1a   : > { %v222_v2 = vld [vmem:[%s754_s3 + $0x80] sm:$0xff]  ;;  %v223_v3 = vld [vmem:[%s754_s3 + $0x88] sm:$0xff]  ;;  %v224_v7 = vld [vmem:[%s754_s3 + $0x90] sm:$0xff]  ;;  %s596_s29 = scalar_lea.vmem %s595_s28, 512  ;;  %p597_p1 = scmp.lt.s32.totalorder %s796_s18, %s595_s28 }
  0x1b   : > { %v206_v4 = vld [vmem:[%s754_s3] sm:$0xff]  ;;  %v485_v5 = vpack.c.bf16 %v223_v3, %v222_v2  ;;  %v207_v6 = vld [vmem:[%s754_s3 + $0x8] sm:$0xff]  ;;  %v225_v8 = vld [vmem:[%s754_s3 + $0x98] sm:$0xff]  ;;  %p598_p2 = scmp.lt.s32.totalorder %s596_s29, %s590_s26 }
  0x1c   : > { %v487_v9 = vpack.c.bf16 %v207_v6, %v206_v4  ;;  %v489_v10 = vpack.c.bf16 %v225_v8, %v224_v7  ;;  %v208_v11 = vld [vmem:[%s754_s3 + $0x10] sm:$0xff]  ;;  %v209_v12 = vld [vmem:[%s754_s3 + $0x18] sm:$0xff]  ;;  %v226_v13 = vld [vmem:[%s754_s3 + $0xa0] sm:$0xff] }
  0x1d   : > { %486 = vmatprep.subr.bf16.mxu0 %v485_v5  ;;  %517 = vmatprep.subr.bf16.mxu1 %v485_v5  ;;  %v227_v14 = vld [vmem:[%s754_s3 + $0xa8] sm:$0xff]  ;;  %v491_v15 = vpack.c.bf16 %v209_v12, %v208_v11  ;;  %v210_v17 = vld [vmem:[%s754_s3 + $0x20] sm:$0xff]  ;;  %v228_v19 = vld [vmem:[%s754_s3 + $0xb0] sm:$0xff]  ;;  %p599_p3 = por %p598_p2, %p597_p1 }
  0x1e   : > { %488 = vmatpush3.bf16.msra.mxu0 %v487_v9  ;;  %525 = vmatpush3.bf16.msra.mxu1 %v487_v9  ;;  %v493_v16 = vpack.c.bf16 %v227_v14, %v226_v13  ;;  %v211_v18 = vld [vmem:[%s754_s3 + $0x28] sm:$0xff]  ;;  %v229_v20 = vld [vmem:[%s754_s3 + $0xb8] sm:$0xff]  ;;  %v212_v23 = vld [vmem:[%s754_s3 + $0x30] sm:$0xff] }
  0x1f   : > { %490 = vmatprep.subr.bf16.mxu0 %v489_v10  ;;  %518 = vmatprep.subr.bf16.mxu1 %v489_v10  ;;  %v495_v21 = vpack.c.bf16 %v211_v18, %v210_v17  ;;  %v497_v22 = vpack.c.bf16 %v229_v20, %v228_v19  ;;  %v213_v24 = vld [vmem:[%s754_s3 + $0x38] sm:$0xff]  ;;  %v230_v25 = vld [vmem:[%s754_s3 + $0xc0] sm:$0xff]  ;;  %v231_v26 = vld [vmem:[%s754_s3 + $0xc8] sm:$0xff]  ;;  %p600_p5 = pnand %p599_p3, %p593_p0 }
  0x20   : > { %v499_v27 = vpack.c.bf16 %v213_v24, %v212_v23  ;;  %v501_v28 = vpack.c.bf16 %v231_v26, %v230_v25  ;;  %v214_v29 = vld [vmem:[%s754_s3 + $0x40] sm:$0xff]  ;;  %v215_v30 = vld [vmem:[%s754_s3 + $0x48] sm:$0xff]  ;;  %v232_v31 = vld [vmem:[%s754_s3 + $0xd0] sm:$0xff] }
  0x21   : > { %v233_v32 = vld [vmem:[%s754_s3 + $0xd8] sm:$0xff]  ;;  %v503_v33 = vpack.c.bf16 %v215_v30, %v214_v29  ;;  %v216_v35 = vld [vmem:[%s754_s3 + $0x50] sm:$0xff]  ;;  %v234_v37 = vld [vmem:[%s754_s3 + $0xe0] sm:$0xff] }
  0x22   : > { %492 = vmatpush3.bf16.msra.mxu0 %v491_v15  ;;  %526 = vmatpush3.bf16.msra.mxu1 %v491_v15  ;;  %v505_v34 = vpack.c.bf16 %v233_v32, %v232_v31  ;;  %v217_v36 = vld [vmem:[%s754_s3 + $0x58] sm:$0xff]  ;;  %v235_v38 = vld [vmem:[%s754_s3 + $0xe8] sm:$0xff]  ;;  %v218_v41 = vld [vmem:[%s754_s3 + $0x60] sm:$0xff] }
  0x23   : > { %494 = vmatprep.subr.bf16.mxu0 %v493_v16  ;;  %519 = vmatprep.subr.bf16.mxu1 %v493_v16  ;;  %v507_v39 = vpack.c.bf16 %v217_v36, %v216_v35  ;;  %v509_v40 = vpack.c.bf16 %v235_v38, %v234_v37  ;;  %v219_v42 = vld [vmem:[%s754_s3 + $0x68] sm:$0xff]  ;;  %v236_v43 = vld [vmem:[%s754_s3 + $0xf0] sm:$0xff]  ;;  %v237_v44 = vld [vmem:[%s754_s3 + $0xf8] sm:$0xff] }
  0x24   : > { %v511_v45 = vpack.c.bf16 %v219_v42, %v218_v41  ;;  %v513_v46 = vpack.c.bf16 %v237_v44, %v236_v43  ;;  %v220_v47 = vld [vmem:[%s754_s3 + $0x70] sm:$0xff]  ;;  %v221_v48 = vld [vmem:[%s754_s3 + $0x78] sm:$0xff] }
  0x25   : > { %v515_v49 = vpack.c.bf16 %v221_v48, %v220_v47 }
  0x26   : > { %496 = vmatpush3.bf16.msra.mxu0 %v495_v21  ;;  %527 = vmatpush3.bf16.msra.mxu1 %v495_v21 }
  0x27   : > { %498 = vmatprep.subr.bf16.mxu0 %v497_v22  ;;  %520 = vmatprep.subr.bf16.mxu1 %v497_v22 }
  0x2a   : > { %500 = vmatpush3.bf16.msra.mxu0 %v499_v27  ;;  %528 = vmatpush3.bf16.msra.mxu1 %v499_v27 }
  0x2b   : > { %502 = vmatprep.subr.bf16.mxu0 %v501_v28  ;;  %521 = vmatprep.subr.bf16.mxu1 %v501_v28 }
  0x2e   : > { %504 = vmatpush3.bf16.msra.mxu0 %v503_v33  ;;  %529 = vmatpush3.bf16.msra.mxu1 %v503_v33 }
  0x2f   : > { %506 = vmatprep.subr.bf16.mxu0 %v505_v34  ;;  %522 = vmatprep.subr.bf16.mxu1 %v505_v34 }
  0x32   : > { %508 = vmatpush3.bf16.msra.mxu0 %v507_v39  ;;  %530 = vmatpush3.bf16.msra.mxu1 %v507_v39 }
  0x33   : > { %510 = vmatprep.subr.bf16.mxu0 %v509_v40  ;;  %523 = vmatprep.subr.bf16.mxu1 %v509_v40 }
  0x36   : > { %512 = vmatpush3.bf16.msra.mxu0 %v511_v45  ;;  %531 = vmatpush3.bf16.msra.mxu1 %v511_v45 }
  0x37   : > { %514 = vmatprep.subr.bf16.mxu0 %v513_v46  ;;  %524 = vmatprep.subr.bf16.mxu1 %v513_v46 }
  0x3a   : > { %516 = vmatpush3.bf16.msra.mxu0 %v515_v49  ;;  %532 = vmatpush3.bf16.msra.mxu1 %v515_v49 }
  0x3d   : > { %303 = vmatmul.mubr.f32.vlgmr.msra.gmra.mrb[0].mxu0 %v202_v50  ;;  %308 = vmatmul.mubr.f32.vlgmr.msra.gmra.mrb[0].mxu1 %v204_v51 }
 0x110   : > { %v479_v52 = vpop.f32.mrb[0].mxu0  ;;  %v482_v53 = vpop.f32.mrb[0].mxu1 }
 0x111   : > { %v480_v54 = vpop.f32.mrb[1].mxu0  ;;  %v483_v55 = vpop.f32.mrb[1].mxu1 }
 0x112   : > { %v481_v56 = vadd.f32 %v480_v54, %v479_v52  ;;  %v484_v57 = vadd.f32 %v483_v55, %v482_v53 }
 0x114   : > { %314 = vst.msk [vmem:[%s185_s16] sm:$0xff] %vm313_vm0, %v481_v56  ;;  %315 = vst.msk [vmem:[%s185_s16 + $0x8] sm:$0xff] %vm313_vm0, %v484_v57 }
 0x115   : > { %603 = shalt.err (!%p600_p5)
}
 0x116   : > { %s604_s30 = scalar_lea.hbm %s801_s25, 256  ;;  %s608_s5 = scalar_lea.hbm %s851_s2, 768 }
 0x117   : > { %p605_p6 = scmp.ne.s32.totalorder %s801_s25, %s604_s30  ;;  %p609_p10 = scmp.lt.u32.totalorder %s801_s25, %s851_s2 }
 0x118   : > { %p610_p11 = scmp.lt.u32.totalorder %s608_s5, %s604_s30  ;;  %p612_p13 = scmp.lt.u32.totalorder %s604_s30, %s801_s25 }
 0x119   : > { %p606_p7 = pnand %p605_p6, %p728_p4 }
 0x11a   : > { %p611_p12 = por %p610_p11, %p609_p10 }
 0x11b   : > { %p607_p9 = pneg %p606_p7 }
 0x11c   : > { %p613_p0 = por %p612_p13, %p611_p12 }
 0x11e   : > { %p614_p1 = pnand %p613_p0, %p607_p9 }
 0x120   : > { %617 = shalt.err (!%p614_p1)
}
 0x121   : > { %s671_s8 = smov 128   ;;  %s672_s15 = smov 8  }
 0x122   : > { %533 = dma.vmem_to_hbm [thread:$0]  (%p728_p4), %s796_s18, 256, %s801_s25, %s803_s12, %s671_s8, %s671_s8, %s672_s15  }
 0x123 PF: > { %p539_p2 = scmp.ge.s32.totalorder %s668_s14, 2  ;;  %s348_s16 = sand.u32 1, %s648_s9  }
 0x124   : > { %s349_s20 = scalar_lea.sflag [#allocation3], %s348_s16 }
 0x125   : > { %p536_p3 = pnand %p539_p2, %p735_p8 }
 0x127   : > { %643 = dma.done.wait (!%p536_p3), %s349_s20, 256  }
 0x128   : > { %645 = vsyncadd (!%p536_p3), %s349_s20, 4294967040  ;;  %s15_s14 = sadd.s32 1, %s668_s14   ;;  %s854_s9 = smov %s652_s10 }
 0x129   : > { %p12_p5 = scmp.ge.s32.totalorder %s15_s14, 5   ;;  %s855_s10 = smov %s656_s11 }
 0x12a   : > { %s856_s11 = smov %s741_s22  ;;  %s857_s12 = smov %s664_s13 }
 0x12b   : > { %s858_s13 = smov %s860_s17  ;;  %14 = sbr.rel (!%p12_p5) target bundleno = 4 (0x4), region = 66 }
 0x132   :  { %354 = vsyncpa [#allocation3], 1 }
 0x133   :  { %356 = vsyncpa [#allocation3 + $0x1], 1 }

</bundles_post_ra>
